<compile_context>
chip_gen: v7x
topology: tpu7x:2x2x1
jax: 0.10.0
libtpu: 0.0.40
codegen_flags: <defaults>
</compile_context>

<pallas_src>
import jax
import jax.numpy as jnp
import numpy as np
from jax.experimental import pallas as pl
from jax.experimental.pallas import tpu as pltpu


def _round_up(x, m):
    return (x + m - 1) // m * m


def _vmem_limit_bytes():
    """~3/4 of physical VMEM, capped at 100 MiB (fits v5e/v6e 128 MiB and v7x 64 MiB)."""
    try:
        cap = pltpu.get_tpu_info().vmem_capacity_bytes
    except Exception:
        cap = 64 * 1024 * 1024          # conservative (v7x-sized) fallback
    return int(min(100 * 1024 * 1024, cap * 3 // 4))


# ---------------------------------------------------------------------------
# Kernel
# ---------------------------------------------------------------------------
def lstm_cell_kernel(h_ref, x_ref, c_ref, wh_ref, wx_ref, b_ref, wy_ref, by_ref,
                     h_out_ref, c_out_ref, y_out_ref, gates_ref):
    Hp = c_ref.shape[1]                        # padded hidden width (multiple of 128)

    c_prev = c_ref[...]                        # (TB, Hp) f32

    # Fused gate matmul: two bf16 MXU dots (h-block and x-block of the packed
    # weights) with f32 accumulation plus one pre-summed f32 bias.  The result is
    # parked in VMEM scratch so the per-gate slices below reload lane-aligned
    # blocks instead of keeping the whole (TB, 4*Hp) f32 value live in vregs.
    gates_ref[...] = (
        jnp.dot(h_ref[...], wh_ref[...], preferred_element_type=jnp.float32)
        + jnp.dot(x_ref[...], wx_ref[...], preferred_element_type=jnp.float32)
        + b_ref[...])

    # Gate order (f, i, o, c); consume one gate at a time (<=2 gate-sized live vals).
    ct = jax.nn.sigmoid(gates_ref[:, 0 * Hp:1 * Hp]) * c_prev                 # forget
    ct = ct + (jax.nn.sigmoid(gates_ref[:, 1 * Hp:2 * Hp])                    # input
               * jnp.tanh(gates_ref[:, 3 * Hp:4 * Hp]))                       # candidate
    ht = jax.nn.sigmoid(gates_ref[:, 2 * Hp:3 * Hp]) * jnp.tanh(ct)           # output

    yt = jnp.dot(ht.astype(jnp.bfloat16), wy_ref[...],
                 preferred_element_type=jnp.float32) + by_ref[...]

    h_out_ref[...] = ht.astype(h_out_ref.dtype)
    c_out_ref[...] = ct.astype(c_out_ref.dtype)
    y_out_ref[...] = yt.astype(y_out_ref.dtype)


# ---------------------------------------------------------------------------
# Wrapper
# ---------------------------------------------------------------------------
def lstm_cell(ht_1, ct_1, xt, kparams, out_x_dim):
    """Pallas LSTMCell forward. Returns (ht, ct, yt) with logical shapes."""
    B, H = ht_1.shape
    Xin = xt.shape[1]

    wh, wx, b = kparams["wh"], kparams["wx"], kparams["b"]
    wy, by = kparams["wy"], kparams["by"]
    Hp, Xp, Yp = wh.shape[0], wx.shape[0], wy.shape[1]

    # Batch tiling: pad to a sublane multiple, tile up to 256 rows; when the batch
    # is big enough prefer >=2 grid steps so tile i's EUP work hides under tile
    # i+1's MXU work (and both v7x TensorCores are engaged).
    Bp = _round_up(B, 8)
    TB = min(Bp, 256)
    if Bp // TB < 2 and Bp >= 16:
        TB = _round_up(Bp // 2, 8)
    Bp = _round_up(Bp, TB)

    # TODO(synk): for recurrent (per-timestep) use, keep h/c padded across steps via
    # input_output_aliases or move the time loop into the kernel (grid axis marked
    # "arbitrary", weights resident, x@Ux hoisted out of the recurrence) so the
    # per-step pad/slice and weight re-DMA disappear.
    h = jnp.pad(ht_1.astype(jnp.bfloat16), ((0, Bp - B), (0, Hp - H)))
    x = jnp.pad(xt.astype(jnp.bfloat16), ((0, Bp - B), (0, Xp - Xin)))
    c = jnp.pad(ct_1, ((0, Bp - B), (0, Hp - H)))

    resident = dict(pipeline_mode=pl.Buffered(1))   # constant-index blocks: no double buffer

    out_shapes = (
        jax.ShapeDtypeStruct((Bp, Hp), jnp.float32),
        jax.ShapeDtypeStruct((Bp, Hp), jnp.float32),
        jax.ShapeDtypeStruct((Bp, Yp), jnp.float32),
    )

    # TODO(synk): for H >= ~768 on v7x, add a second grid axis over the gate columns
    # (re-packed per hidden tile) so weight blocks stream instead of being resident.
    h_p, c_p, y_p = pl.pallas_call(
        lstm_cell_kernel,
        out_shape=out_shapes,
        grid=(Bp // TB,),
        in_specs=[
            pl.BlockSpec((TB, Hp), lambda i: (i, 0)),                  # h_{t-1} (bf16)
            pl.BlockSpec((TB, Xp), lambda i: (i, 0)),                  # x_t     (bf16)
            pl.BlockSpec((TB, Hp), lambda i: (i, 0)),                  # c_{t-1} (f32)
            pl.BlockSpec((Hp, 4 * Hp), lambda i: (0, 0), **resident),  # Wh (bf16, resident)
            pl.BlockSpec((Xp, 4 * Hp), lambda i: (0, 0), **resident),  # Ux (bf16, resident)
            pl.BlockSpec((1, 4 * Hp), lambda i: (0, 0), **resident),   # gate bias (f32)
            pl.BlockSpec((Hp, Yp), lambda i: (0, 0), **resident),      # Wy (bf16, resident)
            pl.BlockSpec((1, Yp), lambda i: (0, 0), **resident),       # output bias (f32)
        ],
        out_specs=(
            pl.BlockSpec((TB, Hp), lambda i: (i, 0)),
            pl.BlockSpec((TB, Hp), lambda i: (i, 0)),
            pl.BlockSpec((TB, Yp), lambda i: (i, 0)),
        ),
        scratch_shapes=[pltpu.VMEM((TB, 4 * Hp), jnp.float32)],        # gate pre-activations
        compiler_params=pltpu.CompilerParams(
            dimension_semantics=("parallel",),
            vmem_limit_bytes=_vmem_limit_bytes()),
    )(h, x, c, wh, wx, b, wy, by)

    return h_p[:B, :H], c_p[:B, :H], y_p[:B, :out_x_dim]


# ---------------------------------------------------------------------------
# Parameter init (PyTorch nn.Linear-style) and kernel-side packing
# ---------------------------------------------------------------------------
def init_params(key, h_dim, inp_x_dim, out_x_dim):
    """PyTorch-style Linear init: U(-1/sqrt(fan_in), 1/sqrt(fan_in)).

    Returns logical packed params, gate order (f, i, o, c), weights already
    transposed for x @ W.
    """
    def linear(key, fan_in, fan_out):
        kw, kb = jax.random.split(key)
        bound = 1.0 / np.sqrt(fan_in)
        w = jax.random.uniform(kw, (fan_out, fan_in), jnp.float32, -bound, bound)
        b = jax.random.uniform(kb, (fan_out,), jnp.float32, -bound, bound)
        return w.T, b

    keys = jax.random.split(key, 9)
    wf, bf = linear(keys[0], h_dim, h_dim)
    uf, ubf = linear(keys[1], inp_x_dim, h_dim)
    wi, bi = linear(keys[2], h_dim, h_dim)
    ui, ubi = linear(keys[3], inp_x_dim, h_dim)
    wo, bo = linear(keys[4], h_dim, h_dim)
    uo, ubo = linear(keys[5], inp_x_dim, h_dim)
    wc, bc = linear(keys[6], h_dim, h_dim)
    uc, ubc = linear(keys[7], inp_x_dim, h_dim)
    wy, by = linear(keys[8], h_dim, out_x_dim)

    return {
        "wh": jnp.concatenate([wf, wi, wo, wc], axis=1),       # (H, 4H)
        "bh": jnp.concatenate([bf, bi, bo, bc]),               # (4H,)
        "ux": jnp.concatenate([uf, ui, uo, uc], axis=1),       # (Xin, 4H)
        "bx": jnp.concatenate([ubf, ubi, ubo, ubc]),           # (4H,)
        "wy": wy,                                              # (H, Xout)
        "by": by,                                              # (Xout,)
    }


def pack_kernel_params(params, h_dim, inp_x_dim, out_x_dim):
    """One-time packing: split gate weights into h- and x-row blocks, pre-sum the
    biases, zero-pad every lane dimension to a multiple of 128, and cast the matmul
    weights to bfloat16 (MXU-native; f32 accumulation happens in the kernel)."""
    H, Xin, Y = h_dim, inp_x_dim, out_x_dim
    Hp = _round_up(H, 128)
    Xp = _round_up(Xin, 128)
    Yp = _round_up(Y, 128)

    wh = jnp.zeros((Hp, 4 * Hp), jnp.float32)
    wx = jnp.zeros((Xp, 4 * Hp), jnp.float32)
    b = jnp.zeros((1, 4 * Hp), jnp.float32)
    for g in range(4):
        wh = wh.at[0:H, g * Hp:g * Hp + H].set(params["wh"][:, g * H:(g + 1) * H])
        wx = wx.at[0:Xin, g * Hp:g * Hp + H].set(params["ux"][:, g * H:(g + 1) * H])
        b = b.at[0, g * Hp:g * Hp + H].set(
            params["bh"][g * H:(g + 1) * H] + params["bx"][g * H:(g + 1) * H])

    wy = jnp.zeros((Hp, Yp), jnp.float32).at[0:H, 0:Y].set(params["wy"])
    by = jnp.zeros((1, Yp), jnp.float32).at[0, 0:Y].set(params["by"])

    return {
        "wh": wh.astype(jnp.bfloat16),     # bf16 matmul operands
        "wx": wx.astype(jnp.bfloat16),
        "b": b,                            # biases stay f32 (added after f32 accum)
        "wy": wy.astype(jnp.bfloat16),
        "by": by,
    }


# ---------------------------------------------------------------------------
# Pure-JAX reference (mirrors the PyTorch forward, f32 everywhere)
# ---------------------------------------------------------------------------
def lstm_cell_ref(ht_1, ct_1, xt, params):
    H = ht_1.shape[1]
    gates = (ht_1 @ params["wh"] + params["bh"]
             + xt @ params["ux"] + params["bx"])
    ft = jax.nn.sigmoid(gates[:, 0 * H:1 * H])
    it = jax.nn.sigmoid(gates[:, 1 * H:2 * H])
    ot = jax.nn.sigmoid(gates[:, 2 * H:3 * H])
    ct_cand = jnp.tanh(gates[:, 3 * H:4 * H])
    ct = ft * ct_1 + it * ct_cand
    ht = ot * jnp.tanh(ct)
    yt = ht @ params["wy"] + params["by"]
    return ht, ct, yt


if __name__ == "__main__":
    B, H_DIM, INP_X_DIM, OUT_X_DIM = 8, 32, 16, 24

    key = jax.random.PRNGKey(0)
    k_h, k_c, k_x, k_p = jax.random.split(key, 4)

    ht_1 = jax.random.normal(k_h, (B, H_DIM), jnp.float32)
    ct_1 = jax.random.normal(k_c, (B, H_DIM), jnp.float32)
    xt = jax.random.normal(k_x, (B, INP_X_DIM), jnp.float32)

    params = init_params(k_p, H_DIM, INP_X_DIM, OUT_X_DIM)
    kparams = pack_kernel_params(params, H_DIM, INP_X_DIM, OUT_X_DIM)

    ht, ct, yt = jax.block_until_ready(
        lstm_cell(ht_1, ct_1, xt, kparams, OUT_X_DIM))

    ht_r, ct_r, yt_r = lstm_cell_ref(ht_1, ct_1, xt, params)
    # bf16 matmul operands with f32 accumulation: compare to the f32 reference at a
    # bf16-appropriate tolerance (explicit numerics policy per review).
    np.testing.assert_allclose(np.asarray(ht), np.asarray(ht_r), rtol=2e-2, atol=2e-2)
    np.testing.assert_allclose(np.asarray(ct), np.asarray(ct_r), rtol=2e-2, atol=2e-2)
    np.testing.assert_allclose(np.asarray(yt), np.asarray(yt_r), rtol=2e-2, atol=2e-2)

    print("KERNEL_OK")
</pallas_src>

<mosaic_0001>
module attributes {stable_mosaic.version = 11 : i64} {
  func.func @lstm_cell_kernel(%arg0: i32, %arg1: memref<8x128xbf16, #tpu.memory_space<vmem>>, %arg2: memref<8x128xbf16, #tpu.memory_space<vmem>>, %arg3: memref<8x128xf32, #tpu.memory_space<vmem>>, %arg4: memref<128x512xbf16, #tpu.memory_space<vmem>>, %arg5: memref<128x512xbf16, #tpu.memory_space<vmem>>, %arg6: memref<1x512xf32, #tpu.memory_space<vmem>>, %arg7: memref<128x128xbf16, #tpu.memory_space<vmem>>, %arg8: memref<1x128xf32, #tpu.memory_space<vmem>>, %arg9: memref<8x128xf32, #tpu.memory_space<vmem>>, %arg10: memref<8x128xf32, #tpu.memory_space<vmem>>, %arg11: memref<8x128xf32, #tpu.memory_space<vmem>>, %arg12: memref<8x512xf32, #tpu.memory_space<vmem>>) attributes {dimension_semantics = [#tpu.dimension_semantics<parallel>], iteration_bounds = array<i64: 1>, scalar_prefetch = 0 : i64, scratch_operands = 1 : i64, tpu.core_type = #tpu.core_type<tc>, window_params = [{transform_indices = @transform_0, window_bounds = array<i64: 8, 128>}, {transform_indices = @transform_1, window_bounds = array<i64: 8, 128>}, {transform_indices = @transform_2, window_bounds = array<i64: 8, 128>}, {pipeline_mode = #tpu.pipeline_mode<synchronous>, transform_indices = @transform_3, window_bounds = array<i64: 128, 512>}, {pipeline_mode = #tpu.pipeline_mode<synchronous>, transform_indices = @transform_4, window_bounds = array<i64: 128, 512>}, {pipeline_mode = #tpu.pipeline_mode<synchronous>, transform_indices = @transform_5, window_bounds = array<i64: 1, 512>}, {pipeline_mode = #tpu.pipeline_mode<synchronous>, transform_indices = @transform_6, window_bounds = array<i64: 128, 128>}, {pipeline_mode = #tpu.pipeline_mode<synchronous>, transform_indices = @transform_7, window_bounds = array<i64: 1, 128>}, {transform_indices = @transform_8, window_bounds = array<i64: 8, 128>}, {transform_indices = @transform_9, window_bounds = array<i64: 8, 128>}, {transform_indices = @transform_10, window_bounds = array<i64: 8, 128>}]} {
    %c0 = arith.constant 0 : index
    %c0_0 = arith.constant 0 : index
    %0 = vector.load %arg3[%c0, %c0_0] : memref<8x128xf32, #tpu.memory_space<vmem>>, vector<8x128xf32>
    %c0_1 = arith.constant 0 : index
    %c0_2 = arith.constant 0 : index
    %1 = vector.load %arg1[%c0_1, %c0_2] : memref<8x128xbf16, #tpu.memory_space<vmem>>, vector<8x128xbf16>
    %c0_3 = arith.constant 0 : index
    %c0_4 = arith.constant 0 : index
    %2 = vector.load %arg4[%c0_3, %c0_4] : memref<128x512xbf16, #tpu.memory_space<vmem>>, vector<128x512xbf16>
    %cst = arith.constant dense<0.000000e+00> : vector<8x512xf32>
    %3 = tpu.matmul %1, %2, %cst {dimension_numbers = #tpu.dot_dimension_numbers<[1], [0], [0], [1], [0, 0, 1, 1], [], []>} : vector<8x128xbf16>, vector<128x512xbf16>, vector<8x512xf32> -> vector<8x512xf32>
    %c0_5 = arith.constant 0 : index
    %c0_6 = arith.constant 0 : index
    %4 = vector.load %arg2[%c0_5, %c0_6] : memref<8x128xbf16, #tpu.memory_space<vmem>>, vector<8x128xbf16>
    %c0_7 = arith.constant 0 : index
    %c0_8 = arith.constant 0 : index
    %5 = vector.load %arg5[%c0_7, %c0_8] : memref<128x512xbf16, #tpu.memory_space<vmem>>, vector<128x512xbf16>
    %cst_9 = arith.constant dense<0.000000e+00> : vector<8x512xf32>
    %6 = tpu.matmul %4, %5, %cst_9 {dimension_numbers = #tpu.dot_dimension_numbers<[1], [0], [0], [1], [0, 0, 1, 1], [], []>} : vector<8x128xbf16>, vector<128x512xbf16>, vector<8x512xf32> -> vector<8x512xf32>
    %7 = arith.addf %3, %6 : vector<8x512xf32>
    %c0_10 = arith.constant 0 : index
    %c0_11 = arith.constant 0 : index
    %8 = vector.load %arg6[%c0_10, %c0_11] : memref<1x512xf32, #tpu.memory_space<vmem>>, vector<1x512xf32>
    %9 = vector.broadcast %8 : vector<1x512xf32> to vector<8x512xf32>
    %10 = arith.addf %7, %9 : vector<8x512xf32>
    %c0_12 = arith.constant 0 : index
    %c0_13 = arith.constant 0 : index
    %11 = vector.load %arg12[%c0_12, %c0_13] : memref<8x512xf32, #tpu.memory_space<vmem>>, vector<8x512xf32>
    tpu.vector_store %arg12[%c0_12, %c0_13], %10 {strides = array<i32>} : memref<8x512xf32, #tpu.memory_space<vmem>>, vector<8x512xf32>,
    %c0_14 = arith.constant 0 : index
    %c0_15 = arith.constant 0 : index
    %12 = vector.load %arg12[%c0_14, %c0_15] : memref<8x512xf32, #tpu.memory_space<vmem>>, vector<8x128xf32>
    %13 = arith.negf %12 : vector<8x128xf32>
    %14 = math.exp %13 : vector<8x128xf32>
    %cst_16 = arith.constant 1.000000e+00 : f32
    %15 = vector.broadcast %cst_16 : f32 to vector<8x128xf32>
    %16 = arith.addf %15, %14 : vector<8x128xf32>
    %17 = arith.divf %15, %16 : vector<8x128xf32>
    %18 = arith.mulf %17, %0 : vector<8x128xf32>
    %c0_17 = arith.constant 0 : index
    %c128 = arith.constant 128 : index
    %19 = vector.load %arg12[%c0_17, %c128] : memref<8x512xf32, #tpu.memory_space<vmem>>, vector<8x128xf32>
    %20 = arith.negf %19 : vector<8x128xf32>
    %21 = math.exp %20 : vector<8x128xf32>
    %cst_18 = arith.constant 1.000000e+00 : f32
    %22 = vector.broadcast %cst_18 : f32 to vector<8x128xf32>
    %23 = arith.addf %22, %21 : vector<8x128xf32>
    %24 = arith.divf %22, %23 : vector<8x128xf32>
    %c0_19 = arith.constant 0 : index
    %c384 = arith.constant 384 : index
    %25 = vector.load %arg12[%c0_19, %c384] : memref<8x512xf32, #tpu.memory_space<vmem>>, vector<8x128xf32>
    %26 = math.tanh %25 : vector<8x128xf32>
    %27 = arith.mulf %24, %26 : vector<8x128xf32>
    %28 = arith.addf %18, %27 : vector<8x128xf32>
    %c0_20 = arith.constant 0 : index
    %c256 = arith.constant 256 : index
    %29 = vector.load %arg12[%c0_20, %c256] : memref<8x512xf32, #tpu.memory_space<vmem>>, vector<8x128xf32>
    %30 = arith.negf %29 : vector<8x128xf32>
    %31 = math.exp %30 : vector<8x128xf32>
    %cst_21 = arith.constant 1.000000e+00 : f32
    %32 = vector.broadcast %cst_21 : f32 to vector<8x128xf32>
    %33 = arith.addf %32, %31 : vector<8x128xf32>
    %34 = arith.divf %32, %33 : vector<8x128xf32>
    %35 = math.tanh %28 : vector<8x128xf32>
    %36 = arith.mulf %34, %35 : vector<8x128xf32>
    %37 = arith.truncf %36 : vector<8x128xf32> to vector<8x128xbf16>
    %c0_22 = arith.constant 0 : index
    %c0_23 = arith.constant 0 : index
    %38 = vector.load %arg7[%c0_22, %c0_23] : memref<128x128xbf16, #tpu.memory_space<vmem>>, vector<128x128xbf16>
    %cst_24 = arith.constant dense<0.000000e+00> : vector<8x128xf32>
    %39 = tpu.matmul %37, %38, %cst_24 {dimension_numbers = #tpu.dot_dimension_numbers<[1], [0], [0], [1], [0, 0, 1, 1], [], []>} : vector<8x128xbf16>, vector<128x128xbf16>, vector<8x128xf32> -> vector<8x128xf32>
    %c0_25 = arith.constant 0 : index
    %c0_26 = arith.constant 0 : index
    %40 = vector.load %arg8[%c0_25, %c0_26] : memref<1x128xf32, #tpu.memory_space<vmem>>, vector<1x128xf32>
    %41 = vector.broadcast %40 : vector<1x128xf32> to vector<8x128xf32>
    %42 = arith.addf %39, %41 : vector<8x128xf32>
    %c0_27 = arith.constant 0 : index
    %c0_28 = arith.constant 0 : index
    %43 = vector.load %arg9[%c0_27, %c0_28] : memref<8x128xf32, #tpu.memory_space<vmem>>, vector<8x128xf32>
    tpu.vector_store %arg9[%c0_27, %c0_28], %36 {strides = array<i32>} : memref<8x128xf32, #tpu.memory_space<vmem>>, vector<8x128xf32>,
    %c0_29 = arith.constant 0 : index
    %c0_30 = arith.constant 0 : index
    %44 = vector.load %arg10[%c0_29, %c0_30] : memref<8x128xf32, #tpu.memory_space<vmem>>, vector<8x128xf32>
    tpu.vector_store %arg10[%c0_29, %c0_30], %28 {strides = array<i32>} : memref<8x128xf32, #tpu.memory_space<vmem>>, vector<8x128xf32>,
    %c0_31 = arith.constant 0 : index
    %c0_32 = arith.constant 0 : index
    %45 = vector.load %arg11[%c0_31, %c0_32] : memref<8x128xf32, #tpu.memory_space<vmem>>, vector<8x128xf32>
    tpu.vector_store %arg11[%c0_31, %c0_32], %42 {strides = array<i32>} : memref<8x128xf32, #tpu.memory_space<vmem>>, vector<8x128xf32>,
    return
  }
  func.func @transform_0(%arg0: i32) -> (i32, i32) {
    %c0_i32 = arith.constant 0 : i32
    %c0_i32_0 = arith.constant 0 : i32
    return %arg0, %c0_i32 : i32, i32
  }
  func.func @transform_1(%arg0: i32) -> (i32, i32) {
    %c0_i32 = arith.constant 0 : i32
    %c0_i32_0 = arith.constant 0 : i32
    return %arg0, %c0_i32 : i32, i32
  }
  func.func @transform_2(%arg0: i32) -> (i32, i32) {
    %c0_i32 = arith.constant 0 : i32
    %c0_i32_0 = arith.constant 0 : i32
    return %arg0, %c0_i32 : i32, i32
  }
  func.func @transform_3(%arg0: i32) -> (i32, i32) {
    %c0_i32 = arith.constant 0 : i32
    %c0_i32_0 = arith.constant 0 : i32
    %c0_i32_1 = arith.constant 0 : i32
    return %c0_i32, %c0_i32_0 : i32, i32
  }
  func.func @transform_4(%arg0: i32) -> (i32, i32) {
    %c0_i32 = arith.constant 0 : i32
    %c0_i32_0 = arith.constant 0 : i32
    %c0_i32_1 = arith.constant 0 : i32
    return %c0_i32, %c0_i32_0 : i32, i32
  }
  func.func @transform_5(%arg0: i32) -> (i32, i32) {
    %c0_i32 = arith.constant 0 : i32
    %c0_i32_0 = arith.constant 0 : i32
    %c0_i32_1 = arith.constant 0 : i32
    return %c0_i32, %c0_i32_0 : i32, i32
  }
  func.func @transform_6(%arg0: i32) -> (i32, i32) {
    %c0_i32 = arith.constant 0 : i32
    %c0_i32_0 = arith.constant 0 : i32
    %c0_i32_1 = arith.constant 0 : i32
    return %c0_i32, %c0_i32_0 : i32, i32
  }
  func.func @transform_7(%arg0: i32) -> (i32, i32) {
    %c0_i32 = arith.constant 0 : i32
    %c0_i32_0 = arith.constant 0 : i32
    %c0_i32_1 = arith.constant 0 : i32
    return %c0_i32, %c0_i32_0 : i32, i32
  }
  func.func @transform_8(%arg0: i32) -> (i32, i32) {
    %c0_i32 = arith.constant 0 : i32
    %c0_i32_0 = arith.constant 0 : i32
    return %arg0, %c0_i32 : i32, i32
  }
  func.func @transform_9(%arg0: i32) -> (i32, i32) {
    %c0_i32 = arith.constant 0 : i32
    %c0_i32_0 = arith.constant 0 : i32
    return %arg0, %c0_i32 : i32, i32
  }
  func.func @transform_10(%arg0: i32) -> (i32, i32) {
    %c0_i32 = arith.constant 0 : i32
    %c0_i32_0 = arith.constant 0 : i32
    return %arg0, %c0_i32 : i32, i32
  }
}

</mosaic_0001>

<bundles_post_ra>
// kernel: tpu_custom_call.1
= control target key start
LH: loop header
LB: loop body
LE: loop exit
PB: predicated region body
PF: predicated region fallthrough
CT: control target
= control target key end

     0   :  { %16 = vsyncpa [#allocation4], 0  ;;  %s1540_s0 = inlined_call_operand.hbm [shape: bf16[8,128], index: 0, kind: input, shape index: {}]   ;;  %s1541_s1 = inlined_call_operand.hbm [shape: bf16[8,128], index: 1, kind: input, shape index: {}]   ;;  %s1542_s2 = inlined_call_operand.hbm [shape: f32[8,128], index: 2, kind: input, shape index: {}]   ;;  %s1543_s3 = inlined_call_operand.hbm [shape: bf16[128,512], index: 3, kind: input, shape index: {}]   ;;  %s1544_s4 = inlined_call_operand.hbm [shape: bf16[128,512], index: 4, kind: input, shape index: {}]   ;;  %s1545_s5 = inlined_call_operand.vmem [shape: f32[1,512], index: 5, kind: input, shape index: {}]   ;;  %s1546_s6 = inlined_call_operand.hbm [shape: bf16[128,128], index: 6, kind: input, shape index: {}]   ;;  %s1547_s7 = inlined_call_operand.vmem [shape: f32[1,128], index: 7, kind: input, shape index: {}]   ;;  %s1548_s8 = inlined_call_operand.hbm [shape: f32[8,128], index: 8, kind: output, shape index: {0}]   ;;  %s1549_s9 = inlined_call_operand.hbm [shape: f32[8,128], index: 9, kind: output, shape index: {1}]   ;;  %s1550_s10 = inlined_call_operand.hbm [shape: f32[8,128], index: 10, kind: output, shape index: {2}]  }
   0x1   :  { %17 = vsyncpa [#allocation7], 0 }
   0x2   :  { %18 = vsyncpa [#allocation10], 0 }
   0x3   :  { %19 = vsyncpa [#allocation13], 0 }
   0x4   :  { %20 = vsyncpa [#allocation5], 0 }
   0x5   :  { %21 = vsyncpa [#allocation16], 0  ;;  %s1331_s13 = smov [#allocation6]   ;;  %s1332_s15 = smov [#allocation9]  }
   0x6   :  { %s38_s14 = sshll.u32 %s1331_s13, 4  ;;  %s57_s16 = sshll.u32 %s1332_s15, 4  ;;  %s39_s14 = int_to_ptr.vmem [resolvable:$true] %s38_s14  ;;  %s1402_s16 = int_to_ptr.vmem [resolvable:$true] %s57_s16 }
   0x7   :  { %s1121_s19 = scalar_lea.hbm %s1541_s1, 64 }
   0x8   :  { %p1122_p0 = scmp.ne.s32.totalorder %s1541_s1, %s1121_s19  ;;  %p1125_p1 = scmp.lt.u32.totalorder %s1121_s19, %s1541_s1 }
   0xa   :  { %p1127_p2 = pnand %p1125_p1, %p1122_p0 }
   0xc   :  { %1130 = shalt.err (!%p1127_p2)
}
   0xd   :  { %s1131_s24 = scalar_lea.vmem %s39_s14, 64  ;;  %p1136_p4 = scmp.lt.s32.totalorder %s39_s14, %s39_s14 }
   0xe   :  { %p1132_p3 = scmp.ne.s32.totalorder %s39_s14, %s1131_s24  ;;  %p1137_p5 = scmp.lt.s32.totalorder %s1131_s24, %s1131_s24 }
  0x10   :  { %p1138_p6 = por %p1137_p5, %p1136_p4 }
  0x12   :  { %p1139_p7 = pnand %p1138_p6, %p1132_p3 }
  0x14   :  { %1142 = shalt.err (!%p1139_p7)
}
  0x15   :  { %41 = dma.hbm_to_vmem [thread:$0]  %s1541_s1, 64, %s39_s14, [#allocation7]  }
  0x16   :  { %s1143_s29 = scalar_lea.hbm %s1543_s3, 4096 }
  0x17   :  { %p1144_p8 = scmp.ne.s32.totalorder %s1543_s3, %s1143_s29  ;;  %p1147_p9 = scmp.lt.u32.totalorder %s1143_s29, %s1543_s3 }
  0x19   :  { %p1149_p10 = pnand %p1147_p9, %p1144_p8 }
  0x1b   :  { %1152 = shalt.err (!%p1149_p10)
}
  0x1c   :  { %s1153_s15 = scalar_lea.vmem %s1402_s16, 4096  ;;  %p1158_p12 = scmp.lt.s32.totalorder %s1402_s16, %s1402_s16 }
  0x1d   :  { %p1154_p11 = scmp.ne.s32.totalorder %s1402_s16, %s1153_s15  ;;  %p1159_p13 = scmp.lt.s32.totalorder %s1153_s15, %s1153_s15 }
  0x1f   :  { %p1160_p0 = por %p1159_p13, %p1158_p12 }
  0x21   :  { %p1161_p1 = pnand %p1160_p0, %p1154_p11 }
  0x23   :  { %1164 = shalt.err (!%p1161_p1)
}
  0x24   :  { %s1333_s1 = smov 256   ;;  %s1334_s14 = smov 16  }
  0x25   :  { %63 = dma.hbm_to_vmem [thread:$0]  %s1543_s3, 4096, %s1402_s16, [#allocation10], %s1333_s1, %s1333_s1, %s1334_s14  }
  0x26   :  { %s1335_s19 = smov [#allocation3]   ;;  %s1336_s21 = smov [#allocation8]  }
  0x27   :  { %s28_s20 = sshll.u32 %s1335_s19, 4  ;;  %s48_s22 = sshll.u32 %s1336_s21, 4  ;;  %s29_s20 = int_to_ptr.vmem [resolvable:$true] %s28_s20  ;;  %s49_s22 = int_to_ptr.vmem [resolvable:$true] %s48_s22 }
  0x28   :  { %s1165_s25 = scalar_lea.hbm %s1540_s0, 64 }
  0x29   :  { %p1166_p2 = scmp.ne.s32.totalorder %s1540_s0, %s1165_s25  ;;  %p1169_p3 = scmp.lt.u32.totalorder %s1165_s25, %s1540_s0 }
  0x2b   :  { %p1171_p4 = pnand %p1169_p3, %p1166_p2 }
  0x2d   :  { %1174 = shalt.err (!%p1171_p4)
}
  0x2e   :  { %s1175_s3 = scalar_lea.vmem %s29_s20, 64  ;;  %p1180_p6 = scmp.lt.s32.totalorder %s29_s20, %s29_s20 }
  0x2f   :  { %p1176_p5 = scmp.ne.s32.totalorder %s29_s20, %s1175_s3  ;;  %p1181_p7 = scmp.lt.s32.totalorder %s1175_s3, %s1175_s3 }
  0x31   :  { %p1182_p8 = por %p1181_p7, %p1180_p6 }
  0x33   :  { %p1183_p9 = pnand %p1182_p8, %p1176_p5 }
  0x35   :  { %1186 = shalt.err (!%p1183_p9)
}
  0x36   :  { %31 = dma.hbm_to_vmem [thread:$0]  %s1540_s0, 64, %s29_s20, [#allocation4]  }
  0x37   :  { %s1187_s13 = scalar_lea.hbm %s1542_s2, 128 }
  0x38   :  { %p1188_p10 = scmp.ne.s32.totalorder %s1542_s2, %s1187_s13  ;;  %p1191_p11 = scmp.lt.u32.totalorder %s1187_s13, %s1542_s2 }
  0x3a   :  { %p1193_p12 = pnand %p1191_p11, %p1188_p10 }
  0x3c   :  { %1196 = shalt.err (!%p1193_p12)
}
  0x3d   :  { %s1197_s21 = scalar_lea.vmem %s49_s22, 128  ;;  %p1202_p0 = scmp.lt.s32.totalorder %s49_s22, %s49_s22 }
  0x3e   :  { %p1198_p13 = scmp.ne.s32.totalorder %s49_s22, %s1197_s21  ;;  %p1203_p1 = scmp.lt.s32.totalorder %s1197_s21, %s1197_s21 }
  0x40   :  { %p1204_p2 = por %p1203_p1, %p1202_p0 }
  0x42   :  { %p1205_p3 = pnand %p1204_p2, %p1198_p13 }
  0x44   :  { %1208 = shalt.err (!%p1205_p3)
}
  0x45   :  { %51 = dma.hbm_to_vmem [thread:$0]  %s1542_s2, 128, %s49_s22, [#allocation7]  }
  0x46   :  { %s1337_s23 = smov [#allocation11]   ;;  %s1338_s25 = smov [#allocation12]  }
  0x47   :  { %s69_s24 = sshll.u32 %s1337_s23, 4  ;;  %s83_s26 = sshll.u32 %s1338_s25, 4  ;;  %s70_s24 = int_to_ptr.vmem [resolvable:$true] %s69_s24  ;;  %s1460_s26 = int_to_ptr.vmem [resolvable:$true] %s83_s26 }
  0x48   :  { %s1209_s29 = scalar_lea.hbm %s1544_s4, 4096 }
  0x49   :  { %p1210_p4 = scmp.ne.s32.totalorder %s1544_s4, %s1209_s29  ;;  %p1213_p5 = scmp.lt.u32.totalorder %s1209_s29, %s1544_s4 }
  0x4b   :  { %p1215_p6 = pnand %p1213_p5, %p1210_p4 }
  0x4d   :  { %1218 = shalt.err (!%p1215_p6)
}
  0x4e   :  { %s1219_s2 = scalar_lea.vmem %s70_s24, 4096  ;;  %p1224_p8 = scmp.lt.s32.totalorder %s70_s24, %s70_s24 }
  0x4f   :  { %p1220_p7 = scmp.ne.s32.totalorder %s70_s24, %s1219_s2  ;;  %p1225_p9 = scmp.lt.s32.totalorder %s1219_s2, %s1219_s2 }
  0x51   :  { %p1226_p10 = por %p1225_p9, %p1224_p8 }
  0x53   :  { %p1227_p11 = pnand %p1226_p10, %p1220_p7 }
  0x55   :  { %1230 = shalt.err (!%p1227_p11)
}
  0x56   :  { %75 = dma.hbm_to_vmem [thread:$0]  %s1544_s4, 4096, %s70_s24, [#allocation10], %s1333_s1, %s1333_s1, %s1334_s14  }
  0x57   :  { %s1231_s17 = scalar_lea.hbm %s1546_s6, 1024 }
  0x58   :  { %p1232_p12 = scmp.ne.s32.totalorder %s1546_s6, %s1231_s17  ;;  %p1235_p13 = scmp.lt.u32.totalorder %s1231_s17, %s1546_s6 }
  0x5a   :  { %p1237_p0 = pnand %p1235_p13, %p1232_p12 }
  0x5c   :  { %1240 = shalt.err (!%p1237_p0)
}
  0x5d   :  { %s1241_s20 = scalar_lea.vmem %s1460_s26, 1024  ;;  %p1246_p2 = scmp.lt.s32.totalorder %s1460_s26, %s1460_s26 }
  0x5e   :  { %p1242_p1 = scmp.ne.s32.totalorder %s1460_s26, %s1241_s20  ;;  %p1247_p3 = scmp.lt.s32.totalorder %s1241_s20, %s1241_s20 }
  0x60   :  { %p1248_p4 = por %p1247_p3, %p1246_p2 }
  0x62   :  { %p1249_p5 = pnand %p1248_p4, %p1242_p1 }
  0x64   :  { %1252 = shalt.err (!%p1249_p5)
}
  0x65   :  { %s1339_s4 = smov 64   ;;  %s1340_s1 = smov 4  }
  0x66   :  { %89 = dma.hbm_to_vmem [thread:$0]  %s1546_s6, 1024, %s1460_s26, [#allocation13], %s1339_s4, %s1339_s4, %s1340_s1  }
  0x67   :  { %1319 = dma.done.wait [#allocation4], 64  }
  0x68   :  { %1320 = vsyncadd [#allocation4], 4294967232 }
  0x69   :  { %1321 = dma.done.wait [#allocation7], 192  }
  0x6a   :  { %1322 = vsyncadd [#allocation7], 4294967104 }
  0x6b   :  { %1323 = dma.done.wait [#allocation10], 8192  }
  0x6c   :  { %1324 = vsyncadd [#allocation10], 4294959104 }
  0x6d   :  { %1325 = dma.done.wait [#allocation13], 1024  }
  0x6e   :  { %1326 = vsyncadd [#allocation13], 4294966272  ;;  %v1341_v0 = vmov 0   ;;  %v1001_v1 = vld [vmem:[#allocation11 + $0x4] ss:$16 sps:$4 sm:$0xff]   ;;  %vm1343_vm0 = vmmov 0  }
  0x6f   :  { %370 = vmatprep.mubr.bf16.mxu0 %v1341_v0  ;;  %411 = vmatprep.mubr.bf16.mxu1 %v1341_v0  ;;  %v1003_v2 = vld [vmem:[#allocation11 + $0xc] ss:$16 sps:$4 sm:$0xff]   ;;  %v1005_v3 = vld [vmem:[#allocation11] ss:$16 sps:$4 sm:$0xff]   ;;  %v1006_v4 = vld [vmem:[#allocation11 + $0x8] ss:$16 sps:$4 sm:$0xff]  }
  0x70   :  { %338 = vmatprep.subr.bf16.mxu0 %v1001_v1  ;;  %379 = vmatprep.subr.bf16.mxu1 %v1003_v2  ;;  %v1007_v5 = vld [vmem:[#allocation11 + $0x24] ss:$16 sps:$4 sm:$0xff]   ;;  %v1009_v6 = vld [vmem:[#allocation11 + $0x2c] ss:$16 sps:$4 sm:$0xff]   ;;  %v1011_v7 = vld [vmem:[#allocation11 + $0x20] ss:$16 sps:$4 sm:$0xff]  }
  0x71   :  { %339 = vmatpush1.bf16.msra.mxu0 %v1005_v3  ;;  %380 = vmatpush1.bf16.msra.mxu1 %v1006_v4  ;;  %v1012_v8 = vld [vmem:[#allocation11 + $0x28] ss:$16 sps:$4 sm:$0xff]   ;;  %v1013_v9 = vld [vmem:[#allocation11 + $0x44] ss:$16 sps:$4 sm:$0xff]   ;;  %v1015_v10 = vld [vmem:[#allocation11 + $0x4c] ss:$16 sps:$4 sm:$0xff]  }
  0x72   :  { %340 = vmatprep.subr.bf16.mxu0 %v1007_v5  ;;  %381 = vmatprep.subr.bf16.mxu1 %v1009_v6  ;;  %v1017_v11 = vld [vmem:[#allocation11 + $0x40] ss:$16 sps:$4 sm:$0xff]   ;;  %v1018_v12 = vld [vmem:[#allocation11 + $0x48] ss:$16 sps:$4 sm:$0xff]   ;;  %v1019_v13 = vld [vmem:[#allocation11 + $0x64] ss:$16 sps:$4 sm:$0xff]  }
  0x73   :  { %v1021_v14 = vld [vmem:[#allocation11 + $0x6c] ss:$16 sps:$4 sm:$0xff]   ;;  %v1023_v15 = vld [vmem:[#allocation11 + $0x60] ss:$16 sps:$4 sm:$0xff]   ;;  %v1024_v16 = vld [vmem:[#allocation11 + $0x68] ss:$16 sps:$4 sm:$0xff]  }
  0x74   :  { %v1025_v17 = vld [vmem:[#allocation11 + $0x84] ss:$16 sps:$4 sm:$0xff]   ;;  %v1027_v18 = vld [vmem:[#allocation11 + $0x8c] ss:$16 sps:$4 sm:$0xff]   ;;  %v1029_v19 = vld [vmem:[#allocation11 + $0x80] ss:$16 sps:$4 sm:$0xff]  }
  0x75   :  { %341 = vmatpush1.bf16.msra.mxu0 %v1011_v7  ;;  %382 = vmatpush1.bf16.msra.mxu1 %v1012_v8  ;;  %v1030_v20 = vld [vmem:[#allocation11 + $0x88] ss:$16 sps:$4 sm:$0xff]   ;;  %v1031_v21 = vld [vmem:[#allocation11 + $0xa4] ss:$16 sps:$4 sm:$0xff]   ;;  %v1033_v22 = vld [vmem:[#allocation11 + $0xac] ss:$16 sps:$4 sm:$0xff]  }
  0x76   :  { %342 = vmatprep.subr.bf16.mxu0 %v1013_v9  ;;  %383 = vmatprep.subr.bf16.mxu1 %v1015_v10  ;;  %v1035_v23 = vld [vmem:[#allocation11 + $0xa0] ss:$16 sps:$4 sm:$0xff]   ;;  %v1036_v24 = vld [vmem:[#allocation11 + $0xa8] ss:$16 sps:$4 sm:$0xff]   ;;  %v1037_v25 = vld [vmem:[#allocation11 + $0xc4] ss:$16 sps:$4 sm:$0xff]  }
  0x77   :  { %v1039_v26 = vld [vmem:[#allocation11 + $0xcc] ss:$16 sps:$4 sm:$0xff]   ;;  %v1041_v27 = vld [vmem:[#allocation11 + $0xc0] ss:$16 sps:$4 sm:$0xff]   ;;  %v1042_v28 = vld [vmem:[#allocation11 + $0xc8] ss:$16 sps:$4 sm:$0xff]  }
  0x78   :  { %v1043_v29 = vld [vmem:[#allocation11 + $0xe4] ss:$16 sps:$4 sm:$0xff]   ;;  %v1045_v30 = vld [vmem:[#allocation11 + $0xec] ss:$16 sps:$4 sm:$0xff]   ;;  %v1047_v31 = vld [vmem:[#allocation11 + $0xe0] ss:$16 sps:$4 sm:$0xff]  }
  0x79   :  { %343 = vmatpush1.bf16.msra.mxu0 %v1017_v11  ;;  %384 = vmatpush1.bf16.msra.mxu1 %v1018_v12  ;;  %v1048_v32 = vld [vmem:[#allocation11 + $0xe8] ss:$16 sps:$4 sm:$0xff]   ;;  %v1051_v33 = vld [vmem:[#allocation9 + $0x4] ss:$16 sps:$4 sm:$0xff]   ;;  %v1054_v34 = vld [vmem:[#allocation9 + $0xc] ss:$16 sps:$4 sm:$0xff]  }
  0x7a   :  { %344 = vmatprep.subr.bf16.mxu0 %v1019_v13  ;;  %385 = vmatprep.subr.bf16.mxu1 %v1021_v14  ;;  %v145_v35 = vld [vmem:[#allocation6] sm:$0xf]  ;;  %v1049_v36 = vld [vmem:[#allocation9] ss:$16 sps:$4 sm:$0xff]   ;;  %v1052_v37 = vld [vmem:[#allocation9 + $0x8] ss:$16 sps:$4 sm:$0xff]  }
  0x7b   :  { %v1057_v38 = vld [vmem:[#allocation9 + $0x24] ss:$16 sps:$4 sm:$0xff]   ;;  %v1060_v39 = vld [vmem:[#allocation9 + $0x2c] ss:$16 sps:$4 sm:$0xff]   ;;  %v1055_v40 = vld [vmem:[#allocation9 + $0x20] ss:$16 sps:$4 sm:$0xff]  }
  0x7c   :  { %v1058_v41 = vld [vmem:[#allocation9 + $0x28] ss:$16 sps:$4 sm:$0xff]   ;;  %v1063_v42 = vld [vmem:[#allocation9 + $0x44] ss:$16 sps:$4 sm:$0xff]   ;;  %v1066_v43 = vld [vmem:[#allocation9 + $0x4c] ss:$16 sps:$4 sm:$0xff]  }
  0x7d   :  { %345 = vmatpush1.bf16.msra.mxu0 %v1023_v15  ;;  %386 = vmatpush1.bf16.msra.mxu1 %v1024_v16  ;;  %v1061_v44 = vld [vmem:[#allocation9 + $0x40] ss:$16 sps:$4 sm:$0xff]   ;;  %v1064_v45 = vld [vmem:[#allocation9 + $0x48] ss:$16 sps:$4 sm:$0xff]   ;;  %v1069_v46 = vld [vmem:[#allocation9 + $0x64] ss:$16 sps:$4 sm:$0xff]  }
  0x7e   :  { %346 = vmatprep.subr.bf16.mxu0 %v1025_v17  ;;  %387 = vmatprep.subr.bf16.mxu1 %v1027_v18  ;;  %v1072_v47 = vld [vmem:[#allocation9 + $0x6c] ss:$16 sps:$4 sm:$0xff]   ;;  %v1067_v48 = vld [vmem:[#allocation9 + $0x60] ss:$16 sps:$4 sm:$0xff]   ;;  %v1070_v49 = vld [vmem:[#allocation9 + $0x68] ss:$16 sps:$4 sm:$0xff]  }
  0x7f   :  { %v1075_v50 = vld [vmem:[#allocation9 + $0x84] ss:$16 sps:$4 sm:$0xff]   ;;  %v1078_v51 = vld [vmem:[#allocation9 + $0x8c] ss:$16 sps:$4 sm:$0xff]   ;;  %v1073_v52 = vld [vmem:[#allocation9 + $0x80] ss:$16 sps:$4 sm:$0xff]  }
  0x80   :  { %v1076_v53 = vld [vmem:[#allocation9 + $0x88] ss:$16 sps:$4 sm:$0xff]   ;;  %v1081_v54 = vld [vmem:[#allocation9 + $0xa4] ss:$16 sps:$4 sm:$0xff]   ;;  %v1084_v55 = vld [vmem:[#allocation9 + $0xac] ss:$16 sps:$4 sm:$0xff]  }
  0x81   :  { %347 = vmatpush1.bf16.msra.mxu0 %v1029_v19  ;;  %388 = vmatpush1.bf16.msra.mxu1 %v1030_v20  ;;  %v1079_v56 = vld [vmem:[#allocation9 + $0xa0] ss:$16 sps:$4 sm:$0xff]   ;;  %v1082_v57 = vld [vmem:[#allocation9 + $0xa8] ss:$16 sps:$4 sm:$0xff]   ;;  %v1087_v58 = vld [vmem:[#allocation9 + $0xc4] ss:$16 sps:$4 sm:$0xff]   ;;  %v664_v20 = vlaneseq }
  0x82   :  { %348 = vmatprep.subr.bf16.mxu0 %v1031_v21  ;;  %389 = vmatprep.subr.bf16.mxu1 %v1033_v22  ;;  %v1090_v59 = vld [vmem:[#allocation9 + $0xcc] ss:$16 sps:$4 sm:$0xff]   ;;  %v1085_v60 = vld [vmem:[#allocation9 + $0xc0] ss:$16 sps:$4 sm:$0xff]   ;;  %v1088_v61 = vld [vmem:[#allocation9 + $0xc8] ss:$16 sps:$4 sm:$0xff]  }
  0x83   :  { %v1093_v62 = vld [vmem:[#allocation9 + $0xe4] ss:$16 sps:$4 sm:$0xff]   ;;  %v1096_v63 = vld [vmem:[#allocation9 + $0xec] ss:$16 sps:$4 sm:$0xff]   ;;  %v1094_v1 = vld [vmem:[#allocation9 + $0xe8] ss:$16 sps:$4 sm:$0xff]  }
  0x84   :  { %v112_v2 = vld [vmem:[#allocation3] sm:$0xf]  ;;  %v1097_v3 = vld [vmem:[#allocation12] sm:$0xff]   ;;  %v1342_v4 = vmov 0.0   ;;  %v1098_v5 = vld [vmem:[#allocation12 + $0x8] sm:$0xff]   ;;  %v665_v21 = vshrl.u32 %v664_v20, 7 }
  0x85   :  { %349 = vmatpush1.bf16.msra.mxu0 %v1035_v23  ;;  %390 = vmatpush1.bf16.msra.mxu1 %v1036_v24  ;;  %v1099_v6 = vld [vmem:[#allocation12 + $0x10] sm:$0xff]   ;;  %v1100_v7 = vld [vmem:[#allocation12 + $0x18] sm:$0xff]   ;;  %v1101_v8 = vld [vmem:[#allocation12 + $0x20] sm:$0xff]   ;;  %s1345_s26 = smov [#allocation14]  }
  0x86   :  { %350 = vmatprep.subr.bf16.mxu0 %v1037_v25  ;;  %391 = vmatprep.subr.bf16.mxu1 %v1039_v26  ;;  %v1102_v9 = vld [vmem:[#allocation12 + $0x28] sm:$0xff]   ;;  %v1103_v10 = vld [vmem:[#allocation12 + $0x30] sm:$0xff]   ;;  %v1104_v11 = vld [vmem:[#allocation12 + $0x38] sm:$0xff]   ;;  %v666_v22 = vsub.s32 0, %v665_v21  ;;  %v670_v24 = vsub.s32 1, %v665_v21  ;;  %s841_s27 = sshll.u32 %s1345_s26, 4  ;;  %s842_s27 = int_to_ptr.vmem [resolvable:$true] %s841_s27 }
  0x87   :  { %v662_v23 = vld [vmem:[%s1545_s5] sm:$0xf]  ;;  %s1344_s5 = smov [#allocation15]  }
  0x88   :  { %v667_v25 = vrot.slane %v662_v23, %v666_v22  ;;  %s851_s25 = sshll.u32 %s1344_s5, 4  ;;  %s852_s25 = int_to_ptr.vmem [resolvable:$true] %s851_s25 }
  0x89   :  { %351 = vmatpush1.bf16.msra.mxu0 %v1041_v27  ;;  %392 = vmatpush1.bf16.msra.mxu1 %v1042_v28  ;;  %v671_v28 = vrot.slane %v662_v23, %v670_v24  ;;  %s1253_s28 = scalar_lea.vmem %s852_s25, 128  ;;  %p1258_p7 = scmp.lt.s32.totalorder %s852_s25, %s852_s25 }
  0x8a   :  { %352 = vmatprep.subr.bf16.mxu0 %v1043_v29  ;;  %393 = vmatprep.subr.bf16.mxu1 %v1045_v30  ;;  %p1254_p6 = scmp.ne.s32.totalorder %s852_s25, %s1253_s28  ;;  %p1259_p8 = scmp.lt.s32.totalorder %s1253_s28, %s1253_s28 }
  0x8c   :  { %p1260_p9 = por %p1259_p8, %p1258_p7 }
  0x8d   :  { %353 = vmatpush1.bf16.msra.mxu0 %v1047_v31  ;;  %394 = vmatpush1.bf16.msra.mxu1 %v1048_v32 }
  0x8e   :  { %580 = vmatprep.subr.bf16.mxu0 %v1051_v33  ;;  %621 = vmatprep.subr.bf16.mxu1 %v1054_v34  ;;  %p1261_p10 = pnand %p1260_p9, %p1254_p6 }
  0x90   :  { %371 = vmatmul.mubr.bf16.vlgmr.msra.gmra.mrb[0].mxu0 %v145_v35  ;;  %412 = vmatmul.mubr.bf16.vlgmr.msra.gmra.mrb[0].mxu1 %v145_v35 }
  0x91   :  { %581 = vmatpush1.bf16.msra.mxu0 %v1049_v36  ;;  %622 = vmatpush1.bf16.msra.mxu1 %v1052_v37 }
  0x92   :  { %582 = vmatprep.subr.bf16.mxu0 %v1057_v38  ;;  %623 = vmatprep.subr.bf16.mxu1 %v1060_v39  ;;  %v674_v38 = vsub.s32 2, %v665_v21 }
  0x93   :  { %612 = vmatprep.mubr.bf16.mxu0 %v1341_v0  ;;  %653 = vmatprep.mubr.bf16.mxu1 %v1341_v0  ;;  %v1091_v0 = vld [vmem:[#allocation9 + $0xe0] ss:$16 sps:$4 sm:$0xff]  }
  0x95   :  { %583 = vmatpush1.bf16.msra.mxu0 %v1055_v40  ;;  %624 = vmatpush1.bf16.msra.mxu1 %v1058_v41 }
  0x96   :  { %584 = vmatprep.subr.bf16.mxu0 %v1063_v42  ;;  %625 = vmatprep.subr.bf16.mxu1 %v1066_v43 }
  0x99   :  { %585 = vmatpush1.bf16.msra.mxu0 %v1061_v44  ;;  %626 = vmatpush1.bf16.msra.mxu1 %v1064_v45  ;;  %v675_v44 = vrot.slane %v662_v23, %v674_v38  ;;  %v678_v45 = vsub.s32 3, %v665_v21 }
  0x9a   :  { %586 = vmatprep.subr.bf16.mxu0 %v1069_v46  ;;  %627 = vmatprep.subr.bf16.mxu1 %v1072_v47 }
  0x9b   :  { %v679_v47 = vrot.slane %v662_v23, %v678_v45 }
  0x9d   :  { %587 = vmatpush1.bf16.msra.mxu0 %v1067_v48  ;;  %628 = vmatpush1.bf16.msra.mxu1 %v1070_v49 }
  0x9e   :  { %588 = vmatprep.subr.bf16.mxu0 %v1075_v50  ;;  %629 = vmatprep.subr.bf16.mxu1 %v1078_v51 }
  0xa1   :  { %589 = vmatpush1.bf16.msra.mxu0 %v1073_v52  ;;  %630 = vmatpush1.bf16.msra.mxu1 %v1076_v53 }
  0xa2   :  { %590 = vmatprep.subr.bf16.mxu0 %v1081_v54  ;;  %631 = vmatprep.subr.bf16.mxu1 %v1084_v55  ;;  %v111_v54 = vld [vmem:[#allocation8] sm:$0xff] }
  0xa5   :  { %591 = vmatpush1.bf16.msra.mxu0 %v1079_v56  ;;  %632 = vmatpush1.bf16.msra.mxu1 %v1082_v57 }
  0xa6   :  { %592 = vmatprep.subr.bf16.mxu0 %v1087_v58  ;;  %633 = vmatprep.subr.bf16.mxu1 %v1090_v59 }
  0xa9   :  { %593 = vmatpush1.bf16.msra.mxu0 %v1085_v60  ;;  %634 = vmatpush1.bf16.msra.mxu1 %v1088_v61 }
  0xaa   :  { %594 = vmatprep.subr.bf16.mxu0 %v1093_v62  ;;  %635 = vmatprep.subr.bf16.mxu1 %v1096_v63 }
  0xad   :  { %595 = vmatpush1.bf16.msra.mxu0 %v1091_v0  ;;  %636 = vmatpush1.bf16.msra.mxu1 %v1094_v1 }
  0xae   :  { %965 = vmatprep.subr.bf16.mxu0 %v1342_v4 }
  0xb0   :  { %613 = vmatmul.mubr.bf16.vlgmr.msra.gmra.mrb[4].mxu0 %v112_v2  ;;  %654 = vmatmul.mubr.bf16.vlgmr.msra.gmra.mrb[4].mxu1 %v112_v2 }
  0xb1   :  { %966 = vmatpush3.bf16.msra.mxu0 %v1097_v3  ;;  %981 = vmatprep.mubr.msk.bf16.mxu0 %vm1343_vm0, %v1342_v4 }
  0xb2   :  { %967 = vmatprep.subr.bf16.mxu0 %v1342_v4 }
  0xb5   :  { %968 = vmatpush3.bf16.msra.mxu0 %v1098_v5 }
  0xb6   :  { %969 = vmatprep.subr.bf16.mxu0 %v1342_v4 }
  0xb9   :  { %970 = vmatpush3.bf16.msra.mxu0 %v1099_v6 }
  0xba   :  { %971 = vmatprep.subr.bf16.mxu0 %v1342_v4 }
  0xbd   :  { %972 = vmatpush3.bf16.msra.mxu0 %v1100_v7 }
  0xbe   :  { %973 = vmatprep.subr.bf16.mxu0 %v1342_v4 }
  0xc1   :  { %974 = vmatpush3.bf16.msra.mxu0 %v1101_v8 }
  0xc2   :  { %975 = vmatprep.subr.bf16.mxu0 %v1342_v4 }
  0xc5   :  { %976 = vmatpush3.bf16.msra.mxu0 %v1102_v9 }
  0xc6   :  { %977 = vmatprep.subr.bf16.mxu0 %v1342_v4 }
  0xc9   :  { %978 = vmatpush3.bf16.msra.mxu0 %v1103_v10 }
  0xca   :  { %979 = vmatprep.subr.bf16.mxu0 %v1342_v4 }
  0xcd   :  { %980 = vmatpush3.bf16.msra.mxu0 %v1104_v11 }
 0x163   :  { %v372_v12 = vpop.f32.mrb[0].mxu0  ;;  %v413_v13 = vpop.f32.mrb[0].mxu1 }
 0x164   :  { %v374_v14 = vpop.f32.mrb[1].mxu0  ;;  %v415_v15 = vpop.f32.mrb[1].mxu1 }
 0x165   :  { %v376_v16 = vpop.f32.mrb[2].mxu0  ;;  %v417_v17 = vpop.f32.mrb[2].mxu1 }
 0x166   :  { %v377_v18 = vpop.f32.mrb[3].mxu0  ;;  %v418_v19 = vpop.f32.mrb[3].mxu1 }
 0x183   :  { %v614_v26 = vpop.f32.mrb[4].mxu0  ;;  %v655_v27 = vpop.f32.mrb[4].mxu1 }
 0x184   :  { %v615_v29 = vadd.f32 %v614_v26, %v372_v12  ;;  %v656_v30 = vadd.f32 %v655_v27, %v413_v13  ;;  %v616_v31 = vpop.f32.mrb[5].mxu0  ;;  %v657_v32 = vpop.f32.mrb[5].mxu1 }
 0x185   :  { %v617_v33 = vadd.f32 %v616_v31, %v374_v14  ;;  %v658_v34 = vadd.f32 %v657_v32, %v415_v15  ;;  %v618_v35 = vpop.f32.mrb[6].mxu0  ;;  %v659_v36 = vpop.f32.mrb[6].mxu1 }
 0x186   :  { %v684_v37 = vadd.f32 %v667_v25, %v615_v29  ;;  %v619_v39 = vpop.f32.mrb[7].mxu0  ;;  %v660_v40 = vpop.f32.mrb[7].mxu1  ;;  %v686_v46 = vadd.f32 %v675_v44, %v656_v30 }
 0x187   :  { %v685_v41 = vadd.f32 %v671_v28, %v617_v33  ;;  %v687_v50 = vadd.f32 %v679_v47, %v658_v34 }
 0x188   :  { %v944_v42 = vmul.f32 -1.442695, %v684_v37  ;;  %v946_v48 = vmul.f32 -1.442695, %v686_v46 }
 0x189   :  { %v945_v43 = vmul.f32 -1.442695, %v685_v41 }
 0x18a   :  { %1105 = vpow2.f32 %v944_v42 }
 0x18b   :  { %1107 = vpow2.f32 %v945_v43 }
 0x18c   :  { %1109 = vpow2.f32 %v946_v48 }
 0x194   :  { %v1106_v49 = vpop.eup %1105 }
 0x195   :  { %v696_v51 = vadd.f32 1.0, %v1106_v49  ;;  %v1108_v52 = vpop.eup %1107 }
 0x196   :  { %v704_v53 = vadd.f32 1.0, %v1108_v52  ;;  %v1110_v55 = vpop.eup %1109 }
 0x197   :  { %1111 = vrcp.f32 %v696_v51  ;;  %v715_v60 = vadd.f32 1.0, %v1110_v55 }
 0x198   :  { %1113 = vtanh.f32 %v687_v50 }
 0x199   :  { %1115 = vrcp.f32 %v704_v53 }
 0x19a   :  { %1117 = vrcp.f32 %v715_v60 }
 0x1a1   :  { %v1112_v56 = vpop.eup %1111 }
 0x1a2   :  { %v1114_v57 = vpop.eup %1113  ;;  %v699_v58 = vmul.f32 %v1112_v56, %v111_v54 }
 0x1a3   :  { %v1116_v59 = vpop.eup %1115 }
 0x1a4   :  { %v709_v61 = vmul.f32 %v1116_v59, %v1114_v57  ;;  %v1118_v63 = vpop.eup %1117 }
 0x1a6   :  { %v710_v62 = vadd.f32 %v709_v61, %v699_v58 }
 0x1a8   :  { %1119 = vtanh.f32 %v710_v62  ;;  %833 = vst [vmem:[#allocation15] sm:$0xff] %v710_v62 }
 0x1b2   :  { %v1120_v0 = vpop.eup %1119 }
 0x1b3   :  { %v719_v1 = vmul.f32 %v1120_v0, %v1118_v63 }
 0x1b5   :  { %v720_v2 = vpack.c.bf16 %v719_v1, %v719_v1  ;;  %832 = vst [vmem:[#allocation14] sm:$0xff] %v719_v1 }
 0x1b7   :  { %982 = vmatmul.mubr.bf16.vlgmr.msra.gmra.mrb[8].mxu0 %v720_v2 }
 0x1b8   :  { %1264 = shalt.err (!%p1261_p10)
}
 0x1b9   :  { %s1265_s16 = scalar_lea.hbm %s1549_s9, 128 }
 0x1ba   :  { %p1266_p11 = scmp.ne.s32.totalorder %s1549_s9, %s1265_s16  ;;  %p1269_p12 = scmp.lt.u32.totalorder %s1265_s16, %s1549_s9 }
 0x1bc   :  { %p1271_p13 = pnand %p1269_p12, %p1266_p11 }
 0x1be   :  { %1274 = shalt.err (!%p1271_p13)
}
 0x1bf   :  { %854 = dma.vmem_to_hbm [thread:$0]  %s852_s25, 128, %s1549_s9, [#allocation16]  }
 0x1c0   :  { %s1275_s15 = scalar_lea.vmem %s842_s27, 128  ;;  %p1280_p1 = scmp.lt.s32.totalorder %s842_s27, %s842_s27 }
 0x1c1   :  { %p1276_p0 = scmp.ne.s32.totalorder %s842_s27, %s1275_s15  ;;  %p1281_p2 = scmp.lt.s32.totalorder %s1275_s15, %s1275_s15 }
 0x1c3   :  { %p1282_p3 = por %p1281_p2, %p1280_p1 }
 0x1c5   :  { %p1283_p4 = pnand %p1282_p3, %p1276_p0 }
 0x1c7   :  { %1286 = shalt.err (!%p1283_p4)
}
 0x1c8   :  { %s1287_s19 = scalar_lea.hbm %s1548_s8, 128 }
 0x1c9   :  { %p1288_p5 = scmp.ne.s32.totalorder %s1548_s8, %s1287_s19  ;;  %p1291_p6 = scmp.lt.u32.totalorder %s1287_s19, %s1548_s8 }
 0x1cb   :  { %p1293_p7 = pnand %p1291_p6, %p1288_p5 }
 0x1cd   :  { %1296 = shalt.err (!%p1293_p7)
}
 0x1ce   :  { %844 = dma.vmem_to_hbm [thread:$0]  %s842_s27, 128, %s1548_s8, [#allocation5]   ;;  %v947_v3 = vld [vmem:[%s1547_s7] ss:$0 sm:$0xff] }
 0x1cf   :  { %s1346_s6 = smov [#allocation17]  }
 0x1d0   :  { %s861_s24 = sshll.u32 %s1346_s6, 4  ;;  %s862_s24 = int_to_ptr.vmem [resolvable:$true] %s861_s24 }
 0x1d1   :  { %s1297_s5 = scalar_lea.vmem %s862_s24, 128  ;;  %p1302_p9 = scmp.lt.s32.totalorder %s862_s24, %s862_s24 }
 0x1d2   :  { %p1298_p8 = scmp.ne.s32.totalorder %s862_s24, %s1297_s5  ;;  %p1303_p10 = scmp.lt.s32.totalorder %s1297_s5, %s1297_s5 }
 0x1d4   :  { %p1304_p11 = por %p1303_p10, %p1302_p9 }
 0x1d6   :  { %p1305_p12 = pnand %p1304_p11, %p1298_p8 }
 0x28a   :  { %v826_v4 = vpop.f32.mrb[8].mxu0 }
 0x28b   :  { %v827_v5 = vadd.f32 %v947_v3, %v826_v4  ;;  %v983_v6 = vpop.f32.mrb[9].mxu0 }
 0x28c   :  { %v829_v7 = vpop.f32.mrb[10].mxu0 }
 0x28d   :  { %834 = vst [vmem:[#allocation17] sm:$0xff] %v827_v5  ;;  %v984_v8 = vpop.f32.mrb[11].mxu0 }
 0x28e   :  { %1308 = shalt.err (!%p1305_p12)
}
 0x28f   :  { %s1309_s7 = scalar_lea.hbm %s1550_s10, 128 }
 0x290   :  { %p1310_p13 = scmp.ne.s32.totalorder %s1550_s10, %s1309_s7  ;;  %p1313_p0 = scmp.lt.u32.totalorder %s1309_s7, %s1550_s10 }
 0x292   :  { %p1315_p1 = pnand %p1313_p0, %p1310_p13 }
 0x294   :  { %1318 = shalt.err (!%p1315_p1)
}
 0x295   :  { %864 = dma.vmem_to_hbm [thread:$0]  %s862_s24, 128, %s1550_s10, [#allocation16]  }
 0x296   :  { %1327 = dma.done.wait [#allocation5], 128  }
 0x297   :  { %1328 = vsyncadd [#allocation5], 4294967168 }
 0x298   :  { %1329 = dma.done.wait [#allocation16], 256  }
 0x299   :  { %1330 = vsyncadd [#allocation16], 4294967040 }
 0x29a   :  { %874 = vsyncpa [#allocation4], 1 }
 0x29b   :  { %875 = vsyncpa [#allocation7], 1 }
 0x29c   :  { %876 = vsyncpa [#allocation10], 1 }
 0x29d   :  { %877 = vsyncpa [#allocation13], 1 }
 0x29e   :  { %878 = vsyncpa [#allocation5], 1 }
 0x29f   :  { %879 = vsyncpa [#allocation16], 1 }

</bundles_post_ra>
